<compile_context>
chip_gen: v6e
topology: v6e:2x2x1
jax: 0.10.0
libtpu: 0.0.40
codegen_flags: <defaults>
</compile_context>

<pallas_src>
import jax
import jax.numpy as jnp
from jax import lax
from jax.experimental import pallas as pl
from jax.experimental.pallas import tpu as pltpu


def _round_up(v, m):
    return (v + m - 1) // m * m


def _pick_tile(dim, pref, align, min_blocks=1):
    """Tile size that exactly divides `dim`.

    If `dim` is not `align`-aligned, returns the full extent (legal block dim,
    avoids padding the operand).  Otherwise returns the largest multiple of
    `align` that divides `dim`, is <= `pref`, and (when the dim allows it)
    yields at least `min_blocks` blocks.
    """
    if dim % align != 0:
        return dim
    t = min(pref, dim)
    if min_blocks > 1 and dim >= min_blocks * align:
        t = min(t, dim // min_blocks)
    t = max(align, (t // align) * align)
    while dim % t != 0:
        t -= align
    return t


def _dense_kernel_f32(x_ref, wt_ref, b_ref, o_ref):
    # f32 output path: accumulate directly into the resident output block
    # (o_ref's index_map ignores k, so it stays in VMEM across the K loop).
    # Bias doubles as the k==0 initializer, so there is no epilogue at all.
    @pl.when(pl.program_id(2) == 0)
    def _init():
        o_ref[...] = jnp.broadcast_to(b_ref[...], o_ref.shape)

    o_ref[...] += jnp.dot(x_ref[...], wt_ref[...],
                          preferred_element_type=jnp.float32)


def _dense_kernel_acc(x_ref, wt_ref, b_ref, o_ref, acc_ref):
    # Generic path (non-f32 output): f32 VMEM accumulator, cast on last K step.
    k = pl.program_id(2)

    @pl.when(k == 0)
    def _init():
        acc_ref[...] = jnp.broadcast_to(b_ref[...], acc_ref.shape)

    acc_ref[...] += jnp.dot(x_ref[...], wt_ref[...],
                            preferred_element_type=jnp.float32)

    @pl.when(k == pl.num_programs(2) - 1)
    def _finalize():
        o_ref[...] = acc_ref[...].astype(o_ref.dtype)


def dense_forward(x, weight_t, bias):
    """Dense.forward: (x @ W^T + b)[..., None, None].

    x:        (B, D_in)
    weight_t: (D_in, D_out) -- nn.Linear weight, pre-transposed ONCE at
              parameter-load time (so the kernel never transposes the MXU
              stationary operand per tile).
    bias:     (D_out,)
    returns:  (B, D_out, 1, 1)
    """
    B, d_in = x.shape
    d_in_w, d_out = weight_t.shape
    assert d_in_w == d_in, (weight_t.shape, x.shape)
    assert bias.shape == (d_out,), bias.shape

    out_dtype = x.dtype
    in_bytes = jnp.dtype(x.dtype).itemsize
    w_bytes = jnp.dtype(weight_t.dtype).itemsize
    out_bytes = jnp.dtype(out_dtype).itemsize

    # --- generation-aware VMEM budget (v7x: 64 MiB/TC, v5e/v6e: 128 MiB) ---
    try:
        vmem_cap = pltpu.get_tpu_info().vmem_capacity_bytes
    except Exception:
        vmem_cap = 64 * 1024 * 1024  # conservative fallback
    budget = min(int(0.75 * vmem_cap), 96 * 1024 * 1024)

    # --- tile selection -----------------------------------------------------
    # Sublane alignment follows dtype packing (8 f32, 16 bf16, 32 int8/fp8).
    sub = max(8, 32 // in_bytes)
    big = budget >= 64 * 1024 * 1024
    tm_pref = 512 if big else 256
    tn_pref = 512
    tk_pref = 2048 if big else 1024

    tm = min(tm_pref, _round_up(B, sub))
    # >=2 K blocks when possible so weight DMA overlaps MXU work; >=2 N blocks
    # when d_out >= 256 so v7x's second TensorCore gets a parallel block.
    tk = _pick_tile(d_in, tk_pref, 128, min_blocks=2 if d_in >= 256 else 1)
    tn = _pick_tile(d_out, tn_pref, 128, min_blocks=2 if d_out >= 256 else 1)

    # Only x rows get padded (cheap); the weight and bias are never padded or
    # copied: ragged D_in/D_out are handled with full-extent blocks.
    M = _round_up(B, tm)
    x_p = x if M == B else jnp.pad(x, ((0, M - B), (0, 0)))
    b2d = bias.reshape(1, d_out).astype(jnp.float32)

    m_blocks, n_blocks, k_blocks = M // tm, d_out // tn, d_in // tk
    grid = (m_blocks, n_blocks, k_blocks)

    f32_out = out_dtype == jnp.float32
    kernel = _dense_kernel_f32 if f32_out else _dense_kernel_acc
    scratch = [] if f32_out else [pltpu.VMEM((tm, tn), jnp.float32)]

    # Real streamed traffic: x re-read once per N block, W once per M block.
    cost = pl.CostEstimate(
        flops=2 * B * d_out * d_in,
        transcendentals=0,
        bytes_accessed=int(x_p.size * in_bytes * n_blocks
                           + weight_t.size * w_bytes * m_blocks
                           + b2d.size * 4
                           + M * d_out * out_bytes),
    )

    # Double-buffered inputs + double-buffered output + bias (+ acc if used),
    # with 2x headroom, clamped to the generation-aware budget.
    tile_bytes = (2 * (tm * tk * in_bytes + tk * tn * w_bytes)
                  + 2 * tm * tn * out_bytes
                  + 2 * tn * 4
                  + (0 if f32_out else tm * tn * 4))
    vmem_limit = int(min(budget, max(2 * tile_bytes, 8 * 1024 * 1024)))

    y = pl.pallas_call(
        kernel,
        out_shape=jax.ShapeDtypeStruct((M, d_out), out_dtype),
        grid_spec=pltpu.PrefetchScalarGridSpec(
            num_scalar_prefetch=0,
            grid=grid,
            in_specs=[
                pl.BlockSpec((tm, tk), lambda i, j, k: (i, k)),  # x tile
                pl.BlockSpec((tk, tn), lambda i, j, k: (k, j)),  # W^T tile (no per-tile transpose)
                pl.BlockSpec((1, tn), lambda i, j, k: (0, j)),   # bias tile
            ],
            out_specs=pl.BlockSpec((tm, tn), lambda i, j, k: (i, j)),
            scratch_shapes=scratch,
        ),
        compiler_params=pltpu.CompilerParams(
            dimension_semantics=("parallel", "parallel", "arbitrary"),
            vmem_limit_bytes=vmem_limit,
        ),
        cost_estimate=cost,
    )(x_p, weight_t, b2d)

    y = y[:B]
    # PyTorch: self.dense(x)[..., None, None]
    return y[..., None, None]


def dense_forward_torch_layout(x, weight, bias):
    """Convenience wrapper taking the PyTorch (D_out, D_in) weight layout.
    In production the transpose should be done once at parameter-load time,
    not per call."""
    return dense_forward(x, jnp.transpose(weight), bias)


if __name__ == "__main__":
    key = jax.random.PRNGKey(0)
    k_x, k_w, k_b, k_x2, k_w2, k_b2 = jax.random.split(key, 6)

    # --- module-sized test (B=2, input_dim=32, output_dim=64) ---------------
    B, input_dim, output_dim = 2, 32, 64
    bound = 1.0 / (input_dim ** 0.5)
    weight = jax.random.uniform(k_w, (output_dim, input_dim),
                                minval=-bound, maxval=bound, dtype=jnp.float32)
    bias = jax.random.uniform(k_b, (output_dim,),
                              minval=-bound, maxval=bound, dtype=jnp.float32)
    x = jax.random.normal(k_x, (B, input_dim), dtype=jnp.float32)

    # One-time layout change (would happen when loading the nn.Linear params).
    weight_t = jnp.asarray(weight.T)

    out = jax.block_until_ready(dense_forward(x, weight_t, bias))
    ref = (jnp.dot(x, weight.T, precision=lax.Precision.HIGHEST)
           + bias)[..., None, None]
    assert out.shape == (B, output_dim, 1, 1), out.shape
    assert jnp.allclose(out, ref, atol=1e-5, rtol=1e-5)

    # --- larger shape: multi-block N/K grid, resident-output accumulation ---
    B2, d_in2, d_out2 = 128, 1024, 512
    bound2 = 1.0 / (d_in2 ** 0.5)
    w2 = jax.random.uniform(k_w2, (d_out2, d_in2),
                            minval=-bound2, maxval=bound2, dtype=jnp.float32)
    b2 = jax.random.uniform(k_b2, (d_out2,),
                            minval=-bound2, maxval=bound2, dtype=jnp.float32)
    x2 = jax.random.normal(k_x2, (B2, d_in2), dtype=jnp.float32)
    w2_t = jnp.asarray(w2.T)

    out2 = jax.block_until_ready(dense_forward(x2, w2_t, b2))
    ref2 = (jnp.dot(x2, w2.T, precision=lax.Precision.HIGHEST)
            + b2)[..., None, None]
    assert out2.shape == (B2, d_out2, 1, 1), out2.shape
    assert jnp.allclose(out2, ref2, atol=1e-4, rtol=1e-4)

    print("KERNEL_OK")
</pallas_src>

<mosaic_0001>
module attributes {stable_mosaic.version = 11 : i64} {
  func.func @_dense_kernel_f32(%arg0: i32, %arg1: i32, %arg2: i32, %arg3: memref<8x32xf32, #tpu.memory_space<vmem>>, %arg4: memref<32x64xf32, #tpu.memory_space<vmem>>, %arg5: memref<1x64xf32, #tpu.memory_space<vmem>>, %arg6: memref<8x64xf32, #tpu.memory_space<vmem>>) attributes {dimension_semantics = [#tpu.dimension_semantics<parallel>, #tpu.dimension_semantics<parallel>, #tpu.dimension_semantics<arbitrary>], iteration_bounds = array<i64: 1, 1, 1>, scalar_prefetch = 0 : i64, scratch_operands = 0 : i64, tpu.core_type = #tpu.core_type<tc>, window_params = [{transform_indices = @transform_0, window_bounds = array<i64: 8, 32>}, {transform_indices = @transform_1, window_bounds = array<i64: 32, 64>}, {transform_indices = @transform_2, window_bounds = array<i64: 1, 64>}, {transform_indices = @transform_3, window_bounds = array<i64: 8, 64>}]} {
    %c0_i32 = arith.constant 0 : i32
    %0 = arith.cmpi eq, %arg2, %c0_i32 : i32
    %1 = arith.extui %0 : i1 to i32
    %c0_i32_0 = arith.constant 0 : i32
    %2 = arith.cmpi ne, %1, %c0_i32_0 : i32
    scf.if %2 {
      %c0_8 = arith.constant 0 : index
      %c0_9 = arith.constant 0 : index
      %9 = vector.load %arg5[%c0_8, %c0_9] : memref<1x64xf32, #tpu.memory_space<vmem>>, vector<1x64xf32>
      %10 = vector.shape_cast %9 : vector<1x64xf32> to vector<1x64xf32>
      %11 = vector.broadcast %10 : vector<1x64xf32> to vector<8x64xf32>
      %c0_10 = arith.constant 0 : index
      %c0_11 = arith.constant 0 : index
      %12 = vector.load %arg6[%c0_10, %c0_11] : memref<8x64xf32, #tpu.memory_space<vmem>>, vector<8x64xf32>
      tpu.vector_store %arg6[%c0_10, %c0_11], %11 {strides = array<i32>} : memref<8x64xf32, #tpu.memory_space<vmem>>, vector<8x64xf32>,
    } else {
    }
    %c0 = arith.constant 0 : index
    %c0_1 = arith.constant 0 : index
    %3 = vector.load %arg6[%c0, %c0_1] : memref<8x64xf32, #tpu.memory_space<vmem>>, vector<8x64xf32>
    %c0_2 = arith.constant 0 : index
    %c0_3 = arith.constant 0 : index
    %4 = vector.load %arg3[%c0_2, %c0_3] : memref<8x32xf32, #tpu.memory_space<vmem>>, vector<8x32xf32>
    %c0_4 = arith.constant 0 : index
    %c0_5 = arith.constant 0 : index
    %5 = vector.load %arg4[%c0_4, %c0_5] : memref<32x64xf32, #tpu.memory_space<vmem>>, vector<32x64xf32>
    %cst = arith.constant dense<0.000000e+00> : vector<8x64xf32>
    %6 = tpu.matmul %4, %5, %cst {dimension_numbers = #tpu.dot_dimension_numbers<[1], [0], [0], [1], [0, 0, 1, 1], [], []>} : vector<8x32xf32>, vector<32x64xf32>, vector<8x64xf32> -> vector<8x64xf32>
    %7 = arith.addf %3, %6 : vector<8x64xf32>
    %c0_6 = arith.constant 0 : index
    %c0_7 = arith.constant 0 : index
    %8 = vector.load %arg6[%c0_6, %c0_7] : memref<8x64xf32, #tpu.memory_space<vmem>>, vector<8x64xf32>
    tpu.vector_store %arg6[%c0_6, %c0_7], %7 {strides = array<i32>} : memref<8x64xf32, #tpu.memory_space<vmem>>, vector<8x64xf32>,
    return
  }
  func.func @transform_0(%arg0: i32, %arg1: i32, %arg2: i32) -> (i32, i32) {
    %c0_i32 = arith.constant 0 : i32
    return %arg0, %arg2 : i32, i32
  }
  func.func @transform_1(%arg0: i32, %arg1: i32, %arg2: i32) -> (i32, i32) {
    %c0_i32 = arith.constant 0 : i32
    return %arg2, %arg1 : i32, i32
  }
  func.func @transform_2(%arg0: i32, %arg1: i32, %arg2: i32) -> (i32, i32) {
    %c0_i32 = arith.constant 0 : i32
    %c0_i32_0 = arith.constant 0 : i32
    return %c0_i32, %arg1 : i32, i32
  }
  func.func @transform_3(%arg0: i32, %arg1: i32, %arg2: i32) -> (i32, i32) {
    %c0_i32 = arith.constant 0 : i32
    return %arg0, %arg1 : i32, i32
  }
}

</mosaic_0001>

<bundles_post_ra>
// kernel: tpu_custom_call.1
= control target key start
LH: loop header
LB: loop body
LE: loop exit
PB: predicated region body
PF: predicated region fallthrough
CT: control target
= control target key end

     0   :  { %8 = vsyncpa [#allocation3], 0  ;;  %s285_s0 = inlined_call_operand.hbm [shape: f32[8,32], index: 0, kind: input, shape index: {}]   ;;  %s286_s1 = inlined_call_operand.hbm [shape: f32[32,64], index: 1, kind: input, shape index: {}]   ;;  %s287_s2 = inlined_call_operand.vmem [shape: f32[1,64], index: 2, kind: input, shape index: {}]   ;;  %s288_s3 = inlined_call_operand.hbm [shape: f32[8,64], index: 3, kind: output, shape index: {}]  }
   0x1   :  { %9 = vsyncpa [#allocation6], 0 }
   0x2   :  { %10 = vsyncpa [#allocation4], 0  ;;  %s244_s12 = smov [#allocation2]   ;;  %s245_s14 = smov [#allocation5]  }
   0x3   :  { %s17_s13 = sshll.u32 %s244_s12, 4  ;;  %s26_s15 = sshll.u32 %s245_s14, 4  ;;  %s18_s13 = int_to_ptr.vmem [resolvable:$true] %s17_s13  ;;  %s27_s15 = int_to_ptr.vmem [resolvable:$true] %s26_s15 }
   0x4   :  { %s186_s16 = scalar_lea.vmem %s18_s13, 128  ;;  %p191_p1 = scmp.lt.s32.totalorder %s18_s13, %s18_s13 }
   0x5   :  { %p187_p0 = scmp.ne.s32.totalorder %s18_s13, %s186_s16  ;;  %p192_p2 = scmp.lt.s32.totalorder %s186_s16, %s186_s16 }
   0x7   :  { %p193_p3 = por %p192_p2, %p191_p1 }
   0x9   :  { %p194_p4 = pnand %p193_p3, %p187_p0 }
   0xb   :  { %197 = shalt.err (!%p194_p4)
}
   0xc   :  { %20 = dma.hbm_to_vmem [thread:$0]  %s285_s0, 128, %s18_s13, [#allocation3]  }
   0xd   :  { %s206_s19 = scalar_lea.vmem %s27_s15, 512  ;;  %p211_p6 = scmp.lt.s32.totalorder %s27_s15, %s27_s15 }
   0xe   :  { %p207_p5 = scmp.ne.s32.totalorder %s27_s15, %s206_s19  ;;  %p212_p7 = scmp.lt.s32.totalorder %s206_s19, %s206_s19 }
  0x10   :  { %p213_p8 = por %p212_p7, %p211_p6 }
  0x12   :  { %p214_p9 = pnand %p213_p8, %p207_p5 }
  0x14   :  { %217 = shalt.err (!%p214_p9)
}
  0x15   :  { %s246_s20 = smov 128   ;;  %s247_s21 = smov 8  }
  0x16   :  { %32 = dma.hbm_to_vmem [thread:$0]  %s286_s1, 512, %s27_s15, [#allocation6], %s246_s20, %s246_s20, %s247_s21  }
  0x17   :  { %238 = dma.done.wait [#allocation3], 128  }
  0x18   :  { %239 = vsyncadd [#allocation3], 4294967168 }
  0x19   :  { %240 = dma.done.wait [#allocation6], 512  }
  0x1a   :  { %241 = vsyncadd [#allocation6], 4294966784  ;;  %v248_v0 = vmov 0.0   ;;  %vm249_vm0 = vmmov 0   ;;  %vm52_vm1 = vcmask 523264   ;;  %v59_v2 = vld [vmem:[#allocation5 + $0x18] sm:$0xff] }
  0x1b   :  { %160 = vmatprep.subr.mxu0 %v248_v0  ;;  %168 = vmatprep.mubr.msk.f32.mxu0 %vm249_vm0, %v248_v0  ;;  %v153_v1 = vld [vmem:[%s287_s2] ss:$0 sm:$0xff]  ;;  %v58_v3 = vld [vmem:[#allocation5 + $0x10] sm:$0xff]  ;;  %v57_v4 = vld [vmem:[#allocation5 + $0x8] sm:$0xff]  ;;  %vm60_vm2 = vcmask 261120   ;;  %s250_s1 = smov [#allocation7]  }
  0x1c   :  { %53 = vst.msk [vmem:[#allocation7] sm:$0xff] %vm52_vm1, %v153_v1  ;;  %161 = vmatpush3.msra.mxu0 %v59_v2  ;;  %v56_v5 = vld [vmem:[#allocation5] sm:$0xff]  ;;  %v55_v6 = vld [vmem:[#allocation2] sm:$0xff]  ;;  %s143_s25 = sshll.u32 %s250_s1, 4  ;;  %s144_s25 = int_to_ptr.vmem [resolvable:$true] %s143_s25 }
  0x1d   :  { %162 = vmatprep.subr.mxu0 %v248_v0  ;;  %s218_s2 = scalar_lea.vmem %s144_s25, 128  ;;  %p223_p11 = scmp.lt.s32.totalorder %s144_s25, %s144_s25 }
  0x1e   :  { %163 = vmatpush3.msra.mxu0 %v58_v3  ;;  %p219_p10 = scmp.ne.s32.totalorder %s144_s25, %s218_s2  ;;  %p224_p12 = scmp.lt.s32.totalorder %s218_s2, %s218_s2 }
  0x1f   :  { %164 = vmatprep.subr.mxu0 %v248_v0 }
  0x20   :  { %165 = vmatpush3.msra.mxu0 %v57_v4  ;;  %p225_p13 = por %p224_p12, %p223_p11 }
  0x21   :  { %166 = vmatprep.subr.mxu0 %v248_v0 }
  0x22   :  { %167 = vmatpush3.msra.mxu0 %v56_v5  ;;  %p226_p0 = pnand %p225_p13, %p219_p10 }
  0x23   :  { %169 = vmatmul.mubr.msk.f32.vlgmr.msra.gmra.mxu0 %vm60_vm2, %v55_v6  ;;  %v54_v7 = vld [vmem:[#allocation7] sm:$0xff] }
  0xe3   :  { %v130_v8 = vpop.f32.mrf.mxu0 }
  0xe4   :  { %v134_v9 = vadd.f32 %v130_v8, %v54_v7 }
  0xe5   :  { %v170_v10 = vpop.f32.mrf.mxu0 }
  0xe6   :  { %136 = vst.msk [vmem:[#allocation7] sm:$0xff] %vm52_vm1, %v134_v9 }
  0xe7   :  { %229 = shalt.err (!%p226_p0)
}
  0xe8   :  { %146 = dma.vmem_to_hbm [thread:$0]  %s144_s25, 128, %s288_s3, [#allocation4]  }
  0xe9   :  { %242 = dma.done.wait [#allocation4], 128  }
  0xea   :  { %243 = vsyncadd [#allocation4], 4294967168 }
  0xeb   :  { %150 = vsyncpa [#allocation3], 1 }
  0xec   :  { %151 = vsyncpa [#allocation6], 1 }
  0xed   :  { %152 = vsyncpa [#allocation4], 1 }

</bundles_post_ra>
